<compile_context>
chip_gen: v7x
topology: tpu7x:2x2x1
jax: 0.10.0
libtpu: 0.0.40
codegen_flags: <defaults>
</compile_context>

<pallas_src>
import jax
import jax.numpy as jnp
from jax.experimental import pallas as pl
from jax.experimental.pallas import tpu as pltpu


def _round_up(x: int, m: int) -> int:
    return ((x + m - 1) // m) * m


def _embeddings_kernel(x_ref, w1_ref, b1_ref, w2_ref, b2_ref, o_ref, acc_ref):
    """Grid = (row_tiles, k_tiles); K (vocab) is the reduction axis (last, 'arbitrary').

    x_ref  : (tm, tk)        compute dtype
    w1_ref : (tk, d_pad)     compute dtype
    b1_ref : (1, d_pad)      f32
    w2_ref : (d_pad, d_pad)  compute dtype
    b2_ref : (1, d_pad)      f32
    o_ref  : (tm, d_pad)     f32
    acc_ref: (tm, d_pad)     f32 VMEM scratch accumulating x @ W1 over k tiles.
    """
    k = pl.program_id(1)

    @pl.when(k == 0)
    def _init():
        acc_ref[...] = jnp.zeros_like(acc_ref)

    acc_ref[...] += jnp.dot(
        x_ref[...], w1_ref[...], preferred_element_type=jnp.float32
    )

    @pl.when(k == pl.num_programs(1) - 1)
    def _finalize():
        # Bias + ReLU epilogue in f32 on the accumulator (fast on all chips, incl. v5e).
        h = jnp.maximum(acc_ref[...] + b1_ref[...], 0.0)
        out = jnp.dot(
            h.astype(w2_ref.dtype), w2_ref[...], preferred_element_type=jnp.float32
        )
        o_ref[...] = (out + b2_ref[...]).astype(o_ref.dtype)


def embeddings_forward(x, w1, b1, w2, b2, *, tm=512, tk=512, compute_dtype=None):
    """x: (batch, seq, vocab) -> (batch, seq, d_model) float32.

    w1: (vocab, d_model), b1: (d_model,), w2: (d_model, d_model), b2: (d_model,).
    """
    batch, seq, vocab = x.shape
    d_model = w1.shape[1]
    out_dtype = jnp.float32
    if compute_dtype is None:
        compute_dtype = jnp.float32
    compute_dtype = jnp.dtype(compute_dtype)
    itemsize = compute_dtype.itemsize
    # Sublane packing: f32 -> 8 rows per vreg, bf16 -> 16.
    sublane = {4: 8, 2: 16, 1: 32}.get(itemsize, 8)

    M = batch * seq

    # ---- tile / padding geometry -------------------------------------------------
    # Row tile: as large as allowed, multiple of the sublane count, not bigger than
    # the (rounded-up) row count.  Pad M to a multiple of tm (cdiv-style, no assert).
    tm = max(sublane, _round_up(min(tm, _round_up(M, sublane)), sublane))
    M_pad = _round_up(M, tm)

    # K (vocab) tile: multiple of 128 lanes. W1 is streamed one K-tile at a time.
    tk = max(128, _round_up(min(tk, _round_up(vocab, 128)), 128))
    K_pad = _round_up(vocab, tk)

    # Lane-dense output: pad d_model to a multiple of 128 (unmasked stores).
    d_pad = _round_up(d_model, 128)

    # ---- zero-pad operands (zeros in padded K / d columns contribute nothing) -----
    x_p = jnp.pad(x.reshape(M, vocab).astype(compute_dtype),
                  ((0, M_pad - M), (0, K_pad - vocab)))
    w1_p = jnp.pad(w1.astype(compute_dtype),
                   ((0, K_pad - vocab), (0, d_pad - d_model)))
    w2_p = jnp.pad(w2.astype(compute_dtype),
                   ((0, d_pad - d_model), (0, d_pad - d_model)))
    b1_p = jnp.pad(b1.astype(jnp.float32), (0, d_pad - d_model)).reshape(1, d_pad)
    b2_p = jnp.pad(b2.astype(jnp.float32), (0, d_pad - d_model)).reshape(1, d_pad)

    grid = (M_pad // tm, K_pad // tk)

    # Advisory cost estimate (un-padded math) so XLA can schedule around the call.
    cost = pl.CostEstimate(
        flops=2 * M * vocab * d_model + 2 * M * d_model * d_model,
        transcendentals=0,
        bytes_accessed=(
            (M * vocab + vocab * d_model + d_model * d_model) * itemsize
            + 2 * d_model * 4
            + M * d_model * 4
        ),
    )

    # VMEM budget (worst case: everything double-buffered) with headroom; cap at
    # 64 MiB so the same tiling also fits v7x's smaller physical VMEM.
    vmem_est = (
        2 * tm * tk * itemsize        # x tile
        + 2 * tk * d_pad * itemsize   # W1 K-tile
        + 2 * d_pad * d_pad * itemsize  # W2
        + tm * d_pad * 4              # accumulator
        + 2 * tm * d_pad * 4          # output tile
        + 4 * d_pad * 4               # biases
    )
    vmem_limit = int(min(max(int(vmem_est * 1.5), 32 * 1024 * 1024),
                         64 * 1024 * 1024))

    def _run(single_buffer_weights: bool):
        # Weights/biases whose block index never changes don't need a second buffer.
        resident_kwargs = (
            dict(pipeline_mode=pl.Buffered(1)) if single_buffer_weights else {}
        )
        grid_spec = pltpu.PrefetchScalarGridSpec(
            num_scalar_prefetch=0,
            grid=grid,
            in_specs=[
                pl.BlockSpec((tm, tk), lambda i, k: (i, k)),                        # x
                pl.BlockSpec((tk, d_pad), lambda i, k: (k, 0)),                     # W1 (K-tiled)
                pl.BlockSpec((1, d_pad), lambda i, k: (0, 0), **resident_kwargs),   # b1
                pl.BlockSpec((d_pad, d_pad), lambda i, k: (0, 0), **resident_kwargs),  # W2
                pl.BlockSpec((1, d_pad), lambda i, k: (0, 0), **resident_kwargs),   # b2
            ],
            out_specs=pl.BlockSpec((tm, d_pad), lambda i, k: (i, 0)),
            scratch_shapes=[pltpu.VMEM((tm, d_pad), jnp.float32)],
        )
        out = pl.pallas_call(
            _embeddings_kernel,
            out_shape=jax.ShapeDtypeStruct((M_pad, d_pad), out_dtype),
            grid_spec=grid_spec,
            compiler_params=pltpu.CompilerParams(
                dimension_semantics=("parallel", "arbitrary"),
                vmem_limit_bytes=vmem_limit,
            ),
            cost_estimate=cost,
        )(x_p, w1_p, b1_p, w2_p, b2_p)
        return jax.block_until_ready(out)

    try:
        out_p = _run(True)
    except Exception:
        # pl.Buffered(1) not supported by this JAX/Mosaic version: fall back to the
        # default double-buffered specs (identical semantics, slightly more VMEM).
        out_p = _run(False)

    return out_p[:M, :d_model].reshape(batch, seq, d_model)


def reference_forward(x, w1, b1, w2, b2):
    h = jnp.maximum(jnp.einsum("bsv,vd->bsd", x, w1) + b1, 0.0)
    return jnp.einsum("bsd,de->bse", h, w2) + b2


if __name__ == "__main__":
    # Small shapes consistent with the module (trajectory-style input).
    batch, seq, vocab, d_model = 2, 8, 4, 32

    key = jax.random.PRNGKey(0)
    kx, kw1, kb1, kw2, kb2 = jax.random.split(key, 5)

    x = jax.random.normal(kx, (batch, seq, vocab), dtype=jnp.float32)
    # nn.Linear(vocab, d_model) / nn.Linear(d_model, d_model) weights, stored (in, out).
    w1 = jax.random.normal(kw1, (vocab, d_model), dtype=jnp.float32) * 0.1
    b1 = jax.random.normal(kb1, (d_model,), dtype=jnp.float32) * 0.1
    w2 = jax.random.normal(kw2, (d_model, d_model), dtype=jnp.float32) * 0.1
    b2 = jax.random.normal(kb2, (d_model,), dtype=jnp.float32) * 0.1

    ref = reference_forward(x, w1, b1, w2, b2)

    # f32 compute path: tight check against the reference.
    out = embeddings_forward(x, w1, b1, w2, b2)
    out = jax.block_until_ready(out)
    assert out.shape == (batch, seq, d_model)
    assert jnp.allclose(out, ref, atol=1e-5, rtol=1e-5), "f32 mismatch vs reference"

    # bf16 MXU path (fast path on v6e/v7x): f32 accumulation, looser tolerance.
    out_bf16 = embeddings_forward(x, w1, b1, w2, b2, compute_dtype=jnp.bfloat16)
    out_bf16 = jax.block_until_ready(out_bf16)
    assert jnp.allclose(out_bf16, ref, atol=1e-1, rtol=1e-1), "bf16 mismatch vs reference"

    print("KERNEL_OK")
</pallas_src>

<mosaic_0001>
module attributes {stable_mosaic.version = 11 : i64} {
  func.func @_embeddings_kernel(%arg0: i32, %arg1: i32, %arg2: memref<16x128xf32, #tpu.memory_space<vmem>>, %arg3: memref<128x128xf32, #tpu.memory_space<vmem>>, %arg4: memref<1x128xf32, #tpu.memory_space<vmem>>, %arg5: memref<128x128xf32, #tpu.memory_space<vmem>>, %arg6: memref<1x128xf32, #tpu.memory_space<vmem>>, %arg7: memref<16x128xf32, #tpu.memory_space<vmem>>, %arg8: memref<16x128xf32, #tpu.memory_space<vmem>>) attributes {dimension_semantics = [#tpu.dimension_semantics<parallel>, #tpu.dimension_semantics<arbitrary>], iteration_bounds = array<i64: 1, 1>, scalar_prefetch = 0 : i64, scratch_operands = 1 : i64, tpu.core_type = #tpu.core_type<tc>, window_params = [{transform_indices = @transform_0, window_bounds = array<i64: 16, 128>}, {transform_indices = @transform_1, window_bounds = array<i64: 128, 128>}, {pipeline_mode = #tpu.pipeline_mode<synchronous>, transform_indices = @transform_2, window_bounds = array<i64: 1, 128>}, {pipeline_mode = #tpu.pipeline_mode<synchronous>, transform_indices = @transform_3, window_bounds = array<i64: 128, 128>}, {pipeline_mode = #tpu.pipeline_mode<synchronous>, transform_indices = @transform_4, window_bounds = array<i64: 1, 128>}, {transform_indices = @transform_5, window_bounds = array<i64: 16, 128>}]} {
    %c0_i32 = arith.constant 0 : i32
    %0 = arith.cmpi eq, %arg1, %c0_i32 : i32
    %1 = arith.extui %0 : i1 to i32
    %c0_i32_0 = arith.constant 0 : i32
    %2 = arith.cmpi ne, %1, %c0_i32_0 : i32
    scf.if %2 {
      %cst_10 = arith.constant 0.000000e+00 : f32
      %12 = vector.broadcast %cst_10 : f32 to vector<16x128xf32>
      %c0_11 = arith.constant 0 : index
      %c0_12 = arith.constant 0 : index
      %13 = vector.load %arg8[%c0_11, %c0_12] : memref<16x128xf32, #tpu.memory_space<vmem>>, vector<16x128xf32>
      tpu.vector_store %arg8[%c0_11, %c0_12], %12 {strides = array<i32>} : memref<16x128xf32, #tpu.memory_space<vmem>>, vector<16x128xf32>,
    } else {
    }
    %c0 = arith.constant 0 : index
    %c0_1 = arith.constant 0 : index
    %3 = vector.load %arg8[%c0, %c0_1] : memref<16x128xf32, #tpu.memory_space<vmem>>, vector<16x128xf32>
    %c0_2 = arith.constant 0 : index
    %c0_3 = arith.constant 0 : index
    %4 = vector.load %arg2[%c0_2, %c0_3] : memref<16x128xf32, #tpu.memory_space<vmem>>, vector<16x128xf32>
    %c0_4 = arith.constant 0 : index
    %c0_5 = arith.constant 0 : index
    %5 = vector.load %arg3[%c0_4, %c0_5] : memref<128x128xf32, #tpu.memory_space<vmem>>, vector<128x128xf32>
    %cst = arith.constant dense<0.000000e+00> : vector<16x128xf32>
    %6 = tpu.matmul %4, %5, %cst {dimension_numbers = #tpu.dot_dimension_numbers<[1], [0], [0], [1], [0, 0, 1, 1], [], []>} : vector<16x128xf32>, vector<128x128xf32>, vector<16x128xf32> -> vector<16x128xf32>
    %7 = arith.addf %3, %6 : vector<16x128xf32>
    %c0_6 = arith.constant 0 : index
    %c0_7 = arith.constant 0 : index
    %8 = vector.load %arg8[%c0_6, %c0_7] : memref<16x128xf32, #tpu.memory_space<vmem>>, vector<16x128xf32>
    tpu.vector_store %arg8[%c0_6, %c0_7], %7 {strides = array<i32>} : memref<16x128xf32, #tpu.memory_space<vmem>>, vector<16x128xf32>,
    %c0_i32_8 = arith.constant 0 : i32
    %9 = arith.cmpi eq, %arg1, %c0_i32_8 : i32
    %10 = arith.extui %9 : i1 to i32
    %c0_i32_9 = arith.constant 0 : i32
    %11 = arith.cmpi ne, %10, %c0_i32_9 : i32
    scf.if %11 {
      %c0_10 = arith.constant 0 : index
      %c0_11 = arith.constant 0 : index
      %12 = vector.load %arg8[%c0_10, %c0_11] : memref<16x128xf32, #tpu.memory_space<vmem>>, vector<16x128xf32>
      %c0_12 = arith.constant 0 : index
      %c0_13 = arith.constant 0 : index
      %13 = vector.load %arg4[%c0_12, %c0_13] : memref<1x128xf32, #tpu.memory_space<vmem>>, vector<1x128xf32>
      %14 = vector.broadcast %13 : vector<1x128xf32> to vector<16x128xf32>
      %15 = arith.addf %12, %14 : vector<16x128xf32>
      %cst_14 = arith.constant 0.000000e+00 : f32
      %16 = vector.broadcast %cst_14 : f32 to vector<16x128xf32>
      %17 = arith.maximumf %15, %16 : vector<16x128xf32>
      %c0_15 = arith.constant 0 : index
      %c0_16 = arith.constant 0 : index
      %18 = vector.load %arg5[%c0_15, %c0_16] : memref<128x128xf32, #tpu.memory_space<vmem>>, vector<128x128xf32>
      %cst_17 = arith.constant dense<0.000000e+00> : vector<16x128xf32>
      %19 = tpu.matmul %17, %18, %cst_17 {dimension_numbers = #tpu.dot_dimension_numbers<[1], [0], [0], [1], [0, 0, 1, 1], [], []>} : vector<16x128xf32>, vector<128x128xf32>, vector<16x128xf32> -> vector<16x128xf32>
      %c0_18 = arith.constant 0 : index
      %c0_19 = arith.constant 0 : index
      %20 = vector.load %arg6[%c0_18, %c0_19] : memref<1x128xf32, #tpu.memory_space<vmem>>, vector<1x128xf32>
      %21 = vector.broadcast %20 : vector<1x128xf32> to vector<16x128xf32>
      %22 = arith.addf %19, %21 : vector<16x128xf32>
      %c0_20 = arith.constant 0 : index
      %c0_21 = arith.constant 0 : index
      %23 = vector.load %arg7[%c0_20, %c0_21] : memref<16x128xf32, #tpu.memory_space<vmem>>, vector<16x128xf32>
      tpu.vector_store %arg7[%c0_20, %c0_21], %22 {strides = array<i32>} : memref<16x128xf32, #tpu.memory_space<vmem>>, vector<16x128xf32>,
    } else {
    }
    return
  }
  func.func @transform_0(%arg0: i32, %arg1: i32) -> (i32, i32) {
    %c0_i32 = arith.constant 0 : i32
    return %arg0, %arg1 : i32, i32
  }
  func.func @transform_1(%arg0: i32, %arg1: i32) -> (i32, i32) {
    %c0_i32 = arith.constant 0 : i32
    %c0_i32_0 = arith.constant 0 : i32
    return %arg1, %c0_i32 : i32, i32
  }
  func.func @transform_2(%arg0: i32, %arg1: i32) -> (i32, i32) {
    %c0_i32 = arith.constant 0 : i32
    %c0_i32_0 = arith.constant 0 : i32
    %c0_i32_1 = arith.constant 0 : i32
    return %c0_i32, %c0_i32_0 : i32, i32
  }
  func.func @transform_3(%arg0: i32, %arg1: i32) -> (i32, i32) {
    %c0_i32 = arith.constant 0 : i32
    %c0_i32_0 = arith.constant 0 : i32
    %c0_i32_1 = arith.constant 0 : i32
    return %c0_i32, %c0_i32_0 : i32, i32
  }
  func.func @transform_4(%arg0: i32, %arg1: i32) -> (i32, i32) {
    %c0_i32 = arith.constant 0 : i32
    %c0_i32_0 = arith.constant 0 : i32
    %c0_i32_1 = arith.constant 0 : i32
    return %c0_i32, %c0_i32_0 : i32, i32
  }
  func.func @transform_5(%arg0: i32, %arg1: i32) -> (i32, i32) {
    %c0_i32 = arith.constant 0 : i32
    %c0_i32_0 = arith.constant 0 : i32
    return %arg0, %c0_i32 : i32, i32
  }
}

module attributes {stable_mosaic.version = 11 : i64} {
  func.func @_embeddings_kernel(%arg0: i32, %arg1: i32, %arg2: memref<16x128xf32, #tpu.memory_space<vmem>>, %arg3: memref<128x128xf32, #tpu.memory_space<vmem>>, %arg4: memref<1x128xf32, #tpu.memory_space<vmem>>, %arg5: memref<128x128xf32, #tpu.memory_space<vmem>>, %arg6: memref<1x128xf32, #tpu.memory_space<vmem>>, %arg7: memref<16x128xf32, #tpu.memory_space<vmem>>, %arg8: memref<16x128xf32, #tpu.memory_space<vmem>>) attributes {dimension_semantics = [#tpu.dimension_semantics<parallel>, #tpu.dimension_semantics<arbitrary>], iteration_bounds = array<i64: 1, 1>, scalar_prefetch = 0 : i64, scratch_operands = 1 : i64, tpu.core_type = #tpu.core_type<tc>, window_params = [{transform_indices = @transform_0, window_bounds = array<i64: 16, 128>}, {transform_indices = @transform_1, window_bounds = array<i64: 128, 128>}, {pipeline_mode = #tpu.pipeline_mode<synchronous>, transform_indices = @transform_2, window_bounds = array<i64: 1, 128>}, {pipeline_mode = #tpu.pipeline_mode<synchronous>, transform_indices = @transform_3, window_bounds = array<i64: 128, 128>}, {pipeline_mode = #tpu.pipeline_mode<synchronous>, transform_indices = @transform_4, window_bounds = array<i64: 1, 128>}, {transform_indices = @transform_5, window_bounds = array<i64: 16, 128>}]} {
    %c0_i32 = arith.constant 0 : i32
    %0 = arith.cmpi eq, %arg1, %c0_i32 : i32
    %1 = arith.extui %0 : i1 to i32
    %c0_i32_0 = arith.constant 0 : i32
    %2 = arith.cmpi ne, %1, %c0_i32_0 : i32
    scf.if %2 {
      %cst_10 = arith.constant 0.000000e+00 : f32
      %12 = vector.broadcast %cst_10 : f32 to vector<16x128xf32>
      %c0_11 = arith.constant 0 : index
      %c0_12 = arith.constant 0 : index
      %13 = vector.load %arg8[%c0_11, %c0_12] : memref<16x128xf32, #tpu.memory_space<vmem>>, vector<16x128xf32>
      tpu.vector_store %arg8[%c0_11, %c0_12], %12 {strides = array<i32>} : memref<16x128xf32, #tpu.memory_space<vmem>>, vector<16x128xf32>,
    } else {
    }
    %c0 = arith.constant 0 : index
    %c0_1 = arith.constant 0 : index
    %3 = vector.load %arg8[%c0, %c0_1] : memref<16x128xf32, #tpu.memory_space<vmem>>, vector<16x128xf32>
    %c0_2 = arith.constant 0 : index
    %c0_3 = arith.constant 0 : index
    %4 = vector.load %arg2[%c0_2, %c0_3] : memref<16x128xf32, #tpu.memory_space<vmem>>, vector<16x128xf32>
    %c0_4 = arith.constant 0 : index
    %c0_5 = arith.constant 0 : index
    %5 = vector.load %arg3[%c0_4, %c0_5] : memref<128x128xf32, #tpu.memory_space<vmem>>, vector<128x128xf32>
    %cst = arith.constant dense<0.000000e+00> : vector<16x128xf32>
    %6 = tpu.matmul %4, %5, %cst {dimension_numbers = #tpu.dot_dimension_numbers<[1], [0], [0], [1], [0, 0, 1, 1], [], []>} : vector<16x128xf32>, vector<128x128xf32>, vector<16x128xf32> -> vector<16x128xf32>
    %7 = arith.addf %3, %6 : vector<16x128xf32>
    %c0_6 = arith.constant 0 : index
    %c0_7 = arith.constant 0 : index
    %8 = vector.load %arg8[%c0_6, %c0_7] : memref<16x128xf32, #tpu.memory_space<vmem>>, vector<16x128xf32>
    tpu.vector_store %arg8[%c0_6, %c0_7], %7 {strides = array<i32>} : memref<16x128xf32, #tpu.memory_space<vmem>>, vector<16x128xf32>,
    %c0_i32_8 = arith.constant 0 : i32
    %9 = arith.cmpi eq, %arg1, %c0_i32_8 : i32
    %10 = arith.extui %9 : i1 to i32
    %c0_i32_9 = arith.constant 0 : i32
    %11 = arith.cmpi ne, %10, %c0_i32_9 : i32
    scf.if %11 {
      %c0_10 = arith.constant 0 : index
      %c0_11 = arith.constant 0 : index
      %12 = vector.load %arg8[%c0_10, %c0_11] : memref<16x128xf32, #tpu.memory_space<vmem>>, vector<16x128xf32>
      %c0_12 = arith.constant 0 : index
      %c0_13 = arith.constant 0 : index
      %13 = vector.load %arg4[%c0_12, %c0_13] : memref<1x128xf32, #tpu.memory_space<vmem>>, vector<1x128xf32>
      %14 = vector.broadcast %13 : vector<1x128xf32> to vector<16x128xf32>
      %15 = arith.addf %12, %14 : vector<16x128xf32>
      %cst_14 = arith.constant 0.000000e+00 : f32
      %16 = vector.broadcast %cst_14 : f32 to vector<16x128xf32>
      %17 = arith.maximumf %15, %16 : vector<16x128xf32>
      %c0_15 = arith.constant 0 : index
      %c0_16 = arith.constant 0 : index
      %18 = vector.load %arg5[%c0_15, %c0_16] : memref<128x128xf32, #tpu.memory_space<vmem>>, vector<128x128xf32>
      %cst_17 = arith.constant dense<0.000000e+00> : vector<16x128xf32>
      %19 = tpu.matmul %17, %18, %cst_17 {dimension_numbers = #tpu.dot_dimension_numbers<[1], [0], [0], [1], [0, 0, 1, 1], [], []>} : vector<16x128xf32>, vector<128x128xf32>, vector<16x128xf32> -> vector<16x128xf32>
      %c0_18 = arith.constant 0 : index
      %c0_19 = arith.constant 0 : index
      %20 = vector.load %arg6[%c0_18, %c0_19] : memref<1x128xf32, #tpu.memory_space<vmem>>, vector<1x128xf32>
      %21 = vector.broadcast %20 : vector<1x128xf32> to vector<16x128xf32>
      %22 = arith.addf %19, %21 : vector<16x128xf32>
      %c0_20 = arith.constant 0 : index
      %c0_21 = arith.constant 0 : index
      %23 = vector.load %arg7[%c0_20, %c0_21] : memref<16x128xf32, #tpu.memory_space<vmem>>, vector<16x128xf32>
      tpu.vector_store %arg7[%c0_20, %c0_21], %22 {strides = array<i32>} : memref<16x128xf32, #tpu.memory_space<vmem>>, vector<16x128xf32>,
    } else {
    }
    return
  }
  func.func @transform_0(%arg0: i32, %arg1: i32) -> (i32, i32) {
    %c0_i32 = arith.constant 0 : i32
    return %arg0, %arg1 : i32, i32
  }
  func.func @transform_1(%arg0: i32, %arg1: i32) -> (i32, i32) {
    %c0_i32 = arith.constant 0 : i32
    %c0_i32_0 = arith.constant 0 : i32
    return %arg1, %c0_i32 : i32, i32
  }
  func.func @transform_2(%arg0: i32, %arg1: i32) -> (i32, i32) {
    %c0_i32 = arith.constant 0 : i32
    %c0_i32_0 = arith.constant 0 : i32
    %c0_i32_1 = arith.constant 0 : i32
    return %c0_i32, %c0_i32_0 : i32, i32
  }
  func.func @transform_3(%arg0: i32, %arg1: i32) -> (i32, i32) {
    %c0_i32 = arith.constant 0 : i32
    %c0_i32_0 = arith.constant 0 : i32
    %c0_i32_1 = arith.constant 0 : i32
    return %c0_i32, %c0_i32_0 : i32, i32
  }
  func.func @transform_4(%arg0: i32, %arg1: i32) -> (i32, i32) {
    %c0_i32 = arith.constant 0 : i32
    %c0_i32_0 = arith.constant 0 : i32
    %c0_i32_1 = arith.constant 0 : i32
    return %c0_i32, %c0_i32_0 : i32, i32
  }
  func.func @transform_5(%arg0: i32, %arg1: i32) -> (i32, i32) {
    %c0_i32 = arith.constant 0 : i32
    %c0_i32_0 = arith.constant 0 : i32
    return %arg0, %c0_i32 : i32, i32
  }
}

</mosaic_0001>

<bundles_post_ra>
// kernel: tpu_custom_call.1
= control target key start
LH: loop header
LB: loop body
LE: loop exit
PB: predicated region body
PF: predicated region fallthrough
CT: control target
= control target key end

     0   :  { %10 = vsyncpa [#allocation4], 0  ;;  %s682_s0 = inlined_call_operand.hbm [shape: f32[16,128], index: 0, kind: input, shape index: {}]   ;;  %s683_s1 = inlined_call_operand.hbm [shape: f32[128,128], index: 1, kind: input, shape index: {}]   ;;  %s684_s2 = inlined_call_operand.vmem [shape: f32[1,128], index: 2, kind: input, shape index: {}]   ;;  %s685_s3 = inlined_call_operand.hbm [shape: f32[128,128], index: 3, kind: input, shape index: {}]   ;;  %s686_s4 = inlined_call_operand.vmem [shape: f32[1,128], index: 4, kind: input, shape index: {}]   ;;  %s687_s5 = inlined_call_operand.hbm [shape: f32[16,128], index: 5, kind: output, shape index: {}]  }
   0x1   :  { %11 = vsyncpa [#allocation7], 0 }
   0x2   :  { %12 = vsyncpa [#allocation5], 0  ;;  %s573_s18 = smov [#allocation6]   ;;  %s574_s20 = smov [#allocation3]  }
   0x3   :  { %s30_s19 = sshll.u32 %s573_s18, 4  ;;  %s18_s21 = sshll.u32 %s574_s20, 4  ;;  %s31_s19 = int_to_ptr.vmem [resolvable:$true] %s30_s19  ;;  %s609_s21 = int_to_ptr.vmem [resolvable:$true] %s18_s21 }
   0x4   :  { %s479_s24 = scalar_lea.hbm %s683_s1, 2048 }
   0x5   :  { %p480_p0 = scmp.ne.s32.totalorder %s683_s1, %s479_s24  ;;  %p483_p1 = scmp.lt.u32.totalorder %s479_s24, %s683_s1 }
   0x7   :  { %p485_p2 = pnand %p483_p1, %p480_p0 }
   0x9   :  { %488 = shalt.err (!%p485_p2)
}
   0xa   :  { %s489_s29 = scalar_lea.vmem %s31_s19, 2048  ;;  %p494_p4 = scmp.lt.s32.totalorder %s31_s19, %s31_s19 }
   0xb   :  { %p490_p3 = scmp.ne.s32.totalorder %s31_s19, %s489_s29  ;;  %p495_p5 = scmp.lt.s32.totalorder %s489_s29, %s489_s29 }
   0xd   :  { %p496_p6 = por %p495_p5, %p494_p4 }
   0xf   :  { %p497_p7 = pnand %p496_p6, %p490_p3 }
  0x11   :  { %500 = shalt.err (!%p497_p7)
}
  0x12   :  { %s575_s30 = smov 128   ;;  %s576_s6 = smov 8  }
  0x13   :  { %36 = dma.hbm_to_vmem [thread:$0]  %s683_s1, 2048, %s31_s19, [#allocation7], %s575_s30, %s575_s30, %s576_s6  }
  0x14   :  { %s501_s11 = scalar_lea.hbm %s682_s0, 256 }
  0x15   :  { %p502_p8 = scmp.ne.s32.totalorder %s682_s0, %s501_s11  ;;  %p505_p9 = scmp.lt.u32.totalorder %s501_s11, %s682_s0 }
  0x17   :  { %p507_p10 = pnand %p505_p9, %p502_p8 }
  0x19   :  { %510 = shalt.err (!%p507_p10)
}
  0x1a   :  { %s511_s16 = scalar_lea.vmem %s609_s21, 256  ;;  %p516_p12 = scmp.lt.s32.totalorder %s609_s21, %s609_s21 }
  0x1b   :  { %p512_p11 = scmp.ne.s32.totalorder %s609_s21, %s511_s16  ;;  %p517_p13 = scmp.lt.s32.totalorder %s511_s16, %s511_s16 }
  0x1d   :  { %p518_p0 = por %p517_p13, %p516_p12 }
  0x1f   :  { %p519_p1 = pnand %p518_p0, %p512_p11 }
  0x21   :  { %522 = shalt.err (!%p519_p1)
}
  0x22   :  { %24 = dma.hbm_to_vmem [thread:$0]  %s682_s0, 256, %s609_s21, [#allocation4], %s575_s30, %s575_s30, %s576_s6  }
  0x23   :  { %s577_s18 = smov [#allocation8]   ;;  %s523_s23 = scalar_lea.hbm %s685_s3, 2048 }
  0x24   :  { %s44_s19 = sshll.u32 %s577_s18, 4  ;;  %p524_p2 = scmp.ne.s32.totalorder %s685_s3, %s523_s23  ;;  %s45_s19 = int_to_ptr.vmem [resolvable:$true] %s44_s19 }
  0x25   :  { %p527_p3 = scmp.lt.u32.totalorder %s523_s23, %s685_s3 }
  0x27   :  { %p529_p4 = pnand %p527_p3, %p524_p2 }
  0x29   :  { %532 = shalt.err (!%p529_p4)
}
  0x2a   :  { %s533_s28 = scalar_lea.vmem %s45_s19, 2048  ;;  %p538_p6 = scmp.lt.s32.totalorder %s45_s19, %s45_s19 }
  0x2b   :  { %p534_p5 = scmp.ne.s32.totalorder %s45_s19, %s533_s28  ;;  %p539_p7 = scmp.lt.s32.totalorder %s533_s28, %s533_s28 }
  0x2d   :  { %p540_p8 = por %p539_p7, %p538_p6 }
  0x2f   :  { %p541_p9 = pnand %p540_p8, %p534_p5 }
  0x31   :  { %544 = shalt.err (!%p541_p9)
}
  0x32   :  { %50 = dma.hbm_to_vmem [thread:$0]  %s685_s3, 2048, %s45_s19, [#allocation7], %s575_s30, %s575_s30, %s576_s6  }
  0x33   :  { %567 = dma.done.wait [#allocation4], 256  }
  0x34   :  { %568 = vsyncadd [#allocation4], 4294967040 }
  0x35   :  { %569 = dma.done.wait [#allocation7], 4096  }
  0x36   :  { %570 = vsyncadd [#allocation7], 4294963200  ;;  %v72_v0 = vld [vmem:[#allocation6] sm:$0xff]  ;;  %v73_v1 = vld [vmem:[#allocation6 + $0x8] sm:$0xff]  ;;  %s578_s9 = smov [#allocation9]  }
  0x37   :  { %v74_v2 = vld [vmem:[#allocation6 + $0x10] sm:$0xff]  ;;  %v409_v3 = vpack.c.bf16 %v73_v1, %v72_v0  ;;  %v75_v4 = vld [vmem:[#allocation6 + $0x18] sm:$0xff]  ;;  %v76_v6 = vld [vmem:[#allocation6 + $0x20] sm:$0xff]  ;;  %s288_s10 = sshll.u32 %s578_s9, 4  ;;  %s289_s10 = int_to_ptr.vmem [resolvable:$true] %s288_s10 }
  0x38   :  { %v413_v5 = vpack.c.bf16 %v75_v4, %v74_v2  ;;  %v77_v7 = vld [vmem:[#allocation6 + $0x28] sm:$0xff]  ;;  %v78_v9 = vld [vmem:[#allocation6 + $0x30] sm:$0xff]  ;;  %v79_v10 = vld [vmem:[#allocation6 + $0x38] sm:$0xff]  ;;  %p550_p11 = scmp.lt.s32.totalorder %s289_s10, %s289_s10 }
  0x39   :  { %410 = vmatprep.subr.bf16.mxu0 %v409_v3  ;;  %v417_v8 = vpack.c.bf16 %v77_v7, %v76_v6  ;;  %v70_v11 = vld [vmem:[#allocation3] sm:$0xff]  ;;  %v183_v12 = vld [vmem:[#allocation8] sm:$0xff]  ;;  %v184_v13 = vld [vmem:[#allocation8 + $0x8] sm:$0xff]  ;;  %v421_v20 = vpack.c.bf16 %v79_v10, %v78_v9 }
  0x3a   :  { %412 = vmatpush3.bf16.msra.mxu0 %v409_v3  ;;  %371 = vmatprep.mubr.f32.mxu0 %v70_v11  ;;  %v185_v14 = vld [vmem:[#allocation8 + $0x10] sm:$0xff]  ;;  %v441_v15 = vpack.c.bf16 %v184_v13, %v183_v12  ;;  %v186_v16 = vld [vmem:[#allocation8 + $0x18] sm:$0xff]  ;;  %v187_v18 = vld [vmem:[#allocation8 + $0x20] sm:$0xff] }
  0x3b   :  { %414 = vmatprep.subr.bf16.mxu0 %v413_v5  ;;  %v445_v17 = vpack.c.bf16 %v186_v16, %v185_v14  ;;  %v188_v19 = vld [vmem:[#allocation8 + $0x28] sm:$0xff]  ;;  %v80_v21 = vld [vmem:[#allocation6 + $0x40] sm:$0xff]  ;;  %v189_v24 = vld [vmem:[#allocation8 + $0x30] sm:$0xff] }
  0x3c   :  { %442 = vmatprep.subr.bf16.mxu1 %v441_v15  ;;  %v81_v22 = vld [vmem:[#allocation6 + $0x48] sm:$0xff]  ;;  %v449_v23 = vpack.c.bf16 %v188_v19, %v187_v18  ;;  %v190_v25 = vld [vmem:[#allocation8 + $0x38] sm:$0xff]  ;;  %v82_v27 = vld [vmem:[#allocation6 + $0x50] sm:$0xff] }
  0x3d   :  { %444 = vmatpush3.bf16.msra.mxu1 %v441_v15  ;;  %v425_v26 = vpack.c.bf16 %v81_v22, %v80_v21  ;;  %v83_v28 = vld [vmem:[#allocation6 + $0x58] sm:$0xff]  ;;  %v453_v29 = vpack.c.bf16 %v190_v25, %v189_v24  ;;  %v191_v30 = vld [vmem:[#allocation8 + $0x40] sm:$0xff]  ;;  %v192_v31 = vld [vmem:[#allocation8 + $0x48] sm:$0xff] }
  0x3e   :  { %416 = vmatpush3.bf16.msra.mxu0 %v413_v5  ;;  %446 = vmatprep.subr.bf16.mxu1 %v445_v17  ;;  %v429_v32 = vpack.c.bf16 %v83_v28, %v82_v27  ;;  %v84_v33 = vld [vmem:[#allocation6 + $0x60] sm:$0xff]  ;;  %v85_v34 = vld [vmem:[#allocation6 + $0x68] sm:$0xff]  ;;  %v457_v35 = vpack.c.bf16 %v192_v31, %v191_v30  ;;  %v193_v36 = vld [vmem:[#allocation8 + $0x50] sm:$0xff] }
  0x3f   :  { %418 = vmatprep.subr.bf16.mxu0 %v417_v8  ;;  %v194_v37 = vld [vmem:[#allocation8 + $0x58] sm:$0xff]  ;;  %v433_v38 = vpack.c.bf16 %v85_v34, %v84_v33  ;;  %v86_v39 = vld [vmem:[#allocation6 + $0x70] sm:$0xff]  ;;  %v195_v42 = vld [vmem:[#allocation8 + $0x60] sm:$0xff] }
  0x40   :  { %v87_v40 = vld [vmem:[#allocation6 + $0x78] sm:$0xff]  ;;  %v461_v41 = vpack.c.bf16 %v194_v37, %v193_v36  ;;  %v196_v43 = vld [vmem:[#allocation8 + $0x68] sm:$0xff]  ;;  %v197_v47 = vld [vmem:[#allocation8 + $0x70] sm:$0xff] }
  0x41   :  { %448 = vmatpush3.bf16.msra.mxu1 %v445_v17  ;;  %v437_v44 = vpack.c.bf16 %v87_v40, %v86_v39  ;;  %v465_v45 = vpack.c.bf16 %v196_v43, %v195_v42  ;;  %v71_v46 = vld [vmem:[#allocation3 + $0x8] sm:$0xff]  ;;  %v301_v50 = vld [vmem:[%s684_s2] ss:$0 sm:$0xff]  ;;  %s545_s2 = scalar_lea.vmem %s289_s10, 256 }
  0x42   :  { %420 = vmatpush3.bf16.msra.mxu0 %v417_v8  ;;  %450 = vmatprep.subr.bf16.mxu1 %v449_v23  ;;  %v198_v48 = vld [vmem:[#allocation8 + $0x78] sm:$0xff]  ;;  %v302_v57 = vld [vmem:[%s686_s4] ss:$0 sm:$0xff]  ;;  %p546_p10 = scmp.ne.s32.totalorder %s289_s10, %s545_s2  ;;  %p551_p12 = scmp.lt.s32.totalorder %s545_s2, %s545_s2 }
  0x43   :  { %422 = vmatprep.subr.bf16.mxu0 %v421_v20  ;;  %v469_v49 = vpack.c.bf16 %v198_v48, %v197_v47 }
  0x44   :  { %p552_p13 = por %p551_p12, %p550_p11 }
  0x45   :  { %452 = vmatpush3.bf16.msra.mxu1 %v449_v23 }
  0x46   :  { %424 = vmatpush3.bf16.msra.mxu0 %v421_v20  ;;  %454 = vmatprep.subr.bf16.mxu1 %v453_v29  ;;  %p553_p0 = pnand %p552_p13, %p546_p10 }
  0x47   :  { %426 = vmatprep.subr.bf16.mxu0 %v425_v26 }
  0x49   :  { %456 = vmatpush3.bf16.msra.mxu1 %v453_v29 }
  0x4a   :  { %428 = vmatpush3.bf16.msra.mxu0 %v425_v26  ;;  %458 = vmatprep.subr.bf16.mxu1 %v457_v35 }
  0x4b   :  { %430 = vmatprep.subr.bf16.mxu0 %v429_v32 }
  0x4d   :  { %460 = vmatpush3.bf16.msra.mxu1 %v457_v35 }
  0x4e   :  { %432 = vmatpush3.bf16.msra.mxu0 %v429_v32  ;;  %462 = vmatprep.subr.bf16.mxu1 %v461_v41 }
  0x4f   :  { %434 = vmatprep.subr.bf16.mxu0 %v433_v38 }
  0x51   :  { %464 = vmatpush3.bf16.msra.mxu1 %v461_v41 }
  0x52   :  { %436 = vmatpush3.bf16.msra.mxu0 %v433_v38  ;;  %466 = vmatprep.subr.bf16.mxu1 %v465_v45 }
  0x53   :  { %438 = vmatprep.subr.bf16.mxu0 %v437_v44 }
  0x55   :  { %468 = vmatpush3.bf16.msra.mxu1 %v465_v45 }
  0x56   :  { %440 = vmatpush3.bf16.msra.mxu0 %v437_v44  ;;  %470 = vmatprep.subr.bf16.mxu1 %v469_v49 }
  0x59   :  { %372 = vmatmul.mubr.f32.vlgmr.msra.gmra.mrb[0].mxu0 %v71_v46  ;;  %472 = vmatpush3.bf16.msra.mxu1 %v469_v49 }
 0x12c   :  { %v373_v51 = vpop.f32.mrb[0].mxu0 }
 0x12d   :  { %v180_v52 = vadd.f32 %v373_v51, %v301_v50  ;;  %v154_v53 = vpop.f32.mrb[1].mxu0 }
 0x12e   :  { %v179_v54 = vadd.f32 %v301_v50, %v154_v53 }
 0x12f   :  { %v182_v56 = vmax.f32 %v180_v52, 0.0 }
 0x130   :  { %v181_v55 = vmax.f32 %v179_v54, 0.0 }
 0x132   :  { %406 = vmatprep.mubr.f32.mxu1 %v181_v55 }
 0x133   :  { %407 = vmatmul.mubr.f32.vlgmr.msra.gmra.mrb[0].mxu1 %v182_v56 }
 0x206   :  { %v408_v58 = vpop.f32.mrb[0].mxu1 }
 0x207   :  { %v278_v59 = vadd.f32 %v408_v58, %v302_v57  ;;  %v272_v60 = vpop.f32.mrb[1].mxu1 }
 0x208   :  { %v273_v61 = vadd.f32 %v302_v57, %v272_v60 }
 0x209   :  { %282 = vst [vmem:[#allocation9 + $0x8] sm:$0xff] %v278_v59 }
 0x20a   :  { %281 = vst [vmem:[#allocation9] sm:$0xff] %v273_v61 }
 0x20b   :  { %556 = shalt.err (!%p553_p0)
}
 0x20c   :  { %s557_s4 = scalar_lea.hbm %s687_s5, 256 }
 0x20d   :  { %p558_p1 = scmp.ne.s32.totalorder %s687_s5, %s557_s4  ;;  %p561_p2 = scmp.lt.u32.totalorder %s557_s4, %s687_s5 }
 0x20f   :  { %p563_p3 = pnand %p561_p2, %p558_p1 }
 0x211   :  { %566 = shalt.err (!%p563_p3)
}
 0x212   :  { %294 = dma.vmem_to_hbm [thread:$0]  %s289_s10, 256, %s687_s5, [#allocation5], %s575_s30, %s575_s30, %s576_s6  }
 0x213   :  { %571 = dma.done.wait [#allocation5], 256  }
 0x214   :  { %572 = vsyncadd [#allocation5], 4294967040 }
 0x215   :  { %298 = vsyncpa [#allocation4], 1 }
 0x216   :  { %299 = vsyncpa [#allocation7], 1 }
 0x217   :  { %300 = vsyncpa [#allocation5], 1 }

// kernel: tpu_custom_call.1
= control target key start
LH: loop header
LB: loop body
LE: loop exit
PB: predicated region body
PF: predicated region fallthrough
CT: control target
= control target key end

     0   :  { %10 = vsyncpa [#allocation4], 0  ;;  %s682_s0 = inlined_call_operand.hbm [shape: f32[16,128], index: 0, kind: input, shape index: {}]   ;;  %s683_s1 = inlined_call_operand.hbm [shape: f32[128,128], index: 1, kind: input, shape index: {}]   ;;  %s684_s2 = inlined_call_operand.vmem [shape: f32[1,128], index: 2, kind: input, shape index: {}]   ;;  %s685_s3 = inlined_call_operand.hbm [shape: f32[128,128], index: 3, kind: input, shape index: {}]   ;;  %s686_s4 = inlined_call_operand.vmem [shape: f32[1,128], index: 4, kind: input, shape index: {}]   ;;  %s687_s5 = inlined_call_operand.hbm [shape: f32[16,128], index: 5, kind: output, shape index: {}]  }
   0x1   :  { %11 = vsyncpa [#allocation7], 0 }
   0x2   :  { %12 = vsyncpa [#allocation5], 0  ;;  %s573_s18 = smov [#allocation6]   ;;  %s574_s20 = smov [#allocation3]  }
   0x3   :  { %s30_s19 = sshll.u32 %s573_s18, 4  ;;  %s18_s21 = sshll.u32 %s574_s20, 4  ;;  %s31_s19 = int_to_ptr.vmem [resolvable:$true] %s30_s19  ;;  %s609_s21 = int_to_ptr.vmem [resolvable:$true] %s18_s21 }
   0x4   :  { %s479_s24 = scalar_lea.hbm %s683_s1, 2048 }
   0x5   :  { %p480_p0 = scmp.ne.s32.totalorder %s683_s1, %s479_s24  ;;  %p483_p1 = scmp.lt.u32.totalorder %s479_s24, %s683_s1 }
   0x7   :  { %p485_p2 = pnand %p483_p1, %p480_p0 }
   0x9   :  { %488 = shalt.err (!%p485_p2)
}
   0xa   :  { %s489_s29 = scalar_lea.vmem %s31_s19, 2048  ;;  %p494_p4 = scmp.lt.s32.totalorder %s31_s19, %s31_s19 }
   0xb   :  { %p490_p3 = scmp.ne.s32.totalorder %s31_s19, %s489_s29  ;;  %p495_p5 = scmp.lt.s32.totalorder %s489_s29, %s489_s29 }
   0xd   :  { %p496_p6 = por %p495_p5, %p494_p4 }
   0xf   :  { %p497_p7 = pnand %p496_p6, %p490_p3 }
  0x11   :  { %500 = shalt.err (!%p497_p7)
}
  0x12   :  { %s575_s30 = smov 128   ;;  %s576_s6 = smov 8  }
  0x13   :  { %36 = dma.hbm_to_vmem [thread:$0]  %s683_s1, 2048, %s31_s19, [#allocation7], %s575_s30, %s575_s30, %s576_s6  }
  0x14   :  { %s501_s11 = scalar_lea.hbm %s682_s0, 256 }
  0x15   :  { %p502_p8 = scmp.ne.s32.totalorder %s682_s0, %s501_s11  ;;  %p505_p9 = scmp.lt.u32.totalorder %s501_s11, %s682_s0 }
  0x17   :  { %p507_p10 = pnand %p505_p9, %p502_p8 }
  0x19   :  { %510 = shalt.err (!%p507_p10)
}
  0x1a   :  { %s511_s16 = scalar_lea.vmem %s609_s21, 256  ;;  %p516_p12 = scmp.lt.s32.totalorder %s609_s21, %s609_s21 }
  0x1b   :  { %p512_p11 = scmp.ne.s32.totalorder %s609_s21, %s511_s16  ;;  %p517_p13 = scmp.lt.s32.totalorder %s511_s16, %s511_s16 }
  0x1d   :  { %p518_p0 = por %p517_p13, %p516_p12 }
  0x1f   :  { %p519_p1 = pnand %p518_p0, %p512_p11 }
  0x21   :  { %522 = shalt.err (!%p519_p1)
}
  0x22   :  { %24 = dma.hbm_to_vmem [thread:$0]  %s682_s0, 256, %s609_s21, [#allocation4], %s575_s30, %s575_s30, %s576_s6  }
  0x23   :  { %s577_s18 = smov [#allocation8]   ;;  %s523_s23 = scalar_lea.hbm %s685_s3, 2048 }
  0x24   :  { %s44_s19 = sshll.u32 %s577_s18, 4  ;;  %p524_p2 = scmp.ne.s32.totalorder %s685_s3, %s523_s23  ;;  %s45_s19 = int_to_ptr.vmem [resolvable:$true] %s44_s19 }
  0x25   :  { %p527_p3 = scmp.lt.u32.totalorder %s523_s23, %s685_s3 }
  0x27   :  { %p529_p4 = pnand %p527_p3, %p524_p2 }
  0x29   :  { %532 = shalt.err (!%p529_p4)
}
  0x2a   :  { %s533_s28 = scalar_lea.vmem %s45_s19, 2048  ;;  %p538_p6 = scmp.lt.s32.totalorder %s45_s19, %s45_s19 }
  0x2b   :  { %p534_p5 = scmp.ne.s32.totalorder %s45_s19, %s533_s28  ;;  %p539_p7 = scmp.lt.s32.totalorder %s533_s28, %s533_s28 }
  0x2d   :  { %p540_p8 = por %p539_p7, %p538_p6 }
  0x2f   :  { %p541_p9 = pnand %p540_p8, %p534_p5 }
  0x31   :  { %544 = shalt.err (!%p541_p9)
}
  0x32   :  { %50 = dma.hbm_to_vmem [thread:$0]  %s685_s3, 2048, %s45_s19, [#allocation7], %s575_s30, %s575_s30, %s576_s6  }
  0x33   :  { %567 = dma.done.wait [#allocation4], 256  }
  0x34   :  { %568 = vsyncadd [#allocation4], 4294967040 }
  0x35   :  { %569 = dma.done.wait [#allocation7], 4096  }
  0x36   :  { %570 = vsyncadd [#allocation7], 4294963200  ;;  %v72_v0 = vld [vmem:[#allocation6] sm:$0xff]  ;;  %v73_v1 = vld [vmem:[#allocation6 + $0x8] sm:$0xff]  ;;  %s578_s9 = smov [#allocation9]  }
  0x37   :  { %v74_v2 = vld [vmem:[#allocation6 + $0x10] sm:$0xff]  ;;  %v409_v3 = vpack.c.bf16 %v73_v1, %v72_v0  ;;  %v75_v4 = vld [vmem:[#allocation6 + $0x18] sm:$0xff]  ;;  %v76_v6 = vld [vmem:[#allocation6 + $0x20] sm:$0xff]  ;;  %s288_s10 = sshll.u32 %s578_s9, 4  ;;  %s289_s10 = int_to_ptr.vmem [resolvable:$true] %s288_s10 }
  0x38   :  { %v413_v5 = vpack.c.bf16 %v75_v4, %v74_v2  ;;  %v77_v7 = vld [vmem:[#allocation6 + $0x28] sm:$0xff]  ;;  %v78_v9 = vld [vmem:[#allocation6 + $0x30] sm:$0xff]  ;;  %v79_v10 = vld [vmem:[#allocation6 + $0x38] sm:$0xff]  ;;  %p550_p11 = scmp.lt.s32.totalorder %s289_s10, %s289_s10 }
  0x39   :  { %410 = vmatprep.subr.bf16.mxu0 %v409_v3  ;;  %v417_v8 = vpack.c.bf16 %v77_v7, %v76_v6  ;;  %v70_v11 = vld [vmem:[#allocation3] sm:$0xff]  ;;  %v183_v12 = vld [vmem:[#allocation8] sm:$0xff]  ;;  %v184_v13 = vld [vmem:[#allocation8 + $0x8] sm:$0xff]  ;;  %v421_v20 = vpack.c.bf16 %v79_v10, %v78_v9 }
  0x3a   :  { %412 = vmatpush3.bf16.msra.mxu0 %v409_v3  ;;  %371 = vmatprep.mubr.f32.mxu0 %v70_v11  ;;  %v185_v14 = vld [vmem:[#allocation8 + $0x10] sm:$0xff]  ;;  %v441_v15 = vpack.c.bf16 %v184_v13, %v183_v12  ;;  %v186_v16 = vld [vmem:[#allocation8 + $0x18] sm:$0xff]  ;;  %v187_v18 = vld [vmem:[#allocation8 + $0x20] sm:$0xff] }
  0x3b   :  { %414 = vmatprep.subr.bf16.mxu0 %v413_v5  ;;  %v445_v17 = vpack.c.bf16 %v186_v16, %v185_v14  ;;  %v188_v19 = vld [vmem:[#allocation8 + $0x28] sm:$0xff]  ;;  %v80_v21 = vld [vmem:[#allocation6 + $0x40] sm:$0xff]  ;;  %v189_v24 = vld [vmem:[#allocation8 + $0x30] sm:$0xff] }
  0x3c   :  { %442 = vmatprep.subr.bf16.mxu1 %v441_v15  ;;  %v81_v22 = vld [vmem:[#allocation6 + $0x48] sm:$0xff]  ;;  %v449_v23 = vpack.c.bf16 %v188_v19, %v187_v18  ;;  %v190_v25 = vld [vmem:[#allocation8 + $0x38] sm:$0xff]  ;;  %v82_v27 = vld [vmem:[#allocation6 + $0x50] sm:$0xff] }
  0x3d   :  { %444 = vmatpush3.bf16.msra.mxu1 %v441_v15  ;;  %v425_v26 = vpack.c.bf16 %v81_v22, %v80_v21  ;;  %v83_v28 = vld [vmem:[#allocation6 + $0x58] sm:$0xff]  ;;  %v453_v29 = vpack.c.bf16 %v190_v25, %v189_v24  ;;  %v191_v30 = vld [vmem:[#allocation8 + $0x40] sm:$0xff]  ;;  %v192_v31 = vld [vmem:[#allocation8 + $0x48] sm:$0xff] }
  0x3e   :  { %416 = vmatpush3.bf16.msra.mxu0 %v413_v5  ;;  %446 = vmatprep.subr.bf16.mxu1 %v445_v17  ;;  %v429_v32 = vpack.c.bf16 %v83_v28, %v82_v27  ;;  %v84_v33 = vld [vmem:[#allocation6 + $0x60] sm:$0xff]  ;;  %v85_v34 = vld [vmem:[#allocation6 + $0x68] sm:$0xff]  ;;  %v457_v35 = vpack.c.bf16 %v192_v31, %v191_v30  ;;  %v193_v36 = vld [vmem:[#allocation8 + $0x50] sm:$0xff] }
  0x3f   :  { %418 = vmatprep.subr.bf16.mxu0 %v417_v8  ;;  %v194_v37 = vld [vmem:[#allocation8 + $0x58] sm:$0xff]  ;;  %v433_v38 = vpack.c.bf16 %v85_v34, %v84_v33  ;;  %v86_v39 = vld [vmem:[#allocation6 + $0x70] sm:$0xff]  ;;  %v195_v42 = vld [vmem:[#allocation8 + $0x60] sm:$0xff] }
  0x40   :  { %v87_v40 = vld [vmem:[#allocation6 + $0x78] sm:$0xff]  ;;  %v461_v41 = vpack.c.bf16 %v194_v37, %v193_v36  ;;  %v196_v43 = vld [vmem:[#allocation8 + $0x68] sm:$0xff]  ;;  %v197_v47 = vld [vmem:[#allocation8 + $0x70] sm:$0xff] }
  0x41   :  { %448 = vmatpush3.bf16.msra.mxu1 %v445_v17  ;;  %v437_v44 = vpack.c.bf16 %v87_v40, %v86_v39  ;;  %v465_v45 = vpack.c.bf16 %v196_v43, %v195_v42  ;;  %v71_v46 = vld [vmem:[#allocation3 + $0x8] sm:$0xff]  ;;  %v301_v50 = vld [vmem:[%s684_s2] ss:$0 sm:$0xff]  ;;  %s545_s2 = scalar_lea.vmem %s289_s10, 256 }
  0x42   :  { %420 = vmatpush3.bf16.msra.mxu0 %v417_v8  ;;  %450 = vmatprep.subr.bf16.mxu1 %v449_v23  ;;  %v198_v48 = vld [vmem:[#allocation8 + $0x78] sm:$0xff]  ;;  %v302_v57 = vld [vmem:[%s686_s4] ss:$0 sm:$0xff]  ;;  %p546_p10 = scmp.ne.s32.totalorder %s289_s10, %s545_s2  ;;  %p551_p12 = scmp.lt.s32.totalorder %s545_s2, %s545_s2 }
  0x43   :  { %422 = vmatprep.subr.bf16.mxu0 %v421_v20  ;;  %v469_v49 = vpack.c.bf16 %v198_v48, %v197_v47 }
  0x44   :  { %p552_p13 = por %p551_p12, %p550_p11 }
  0x45   :  { %452 = vmatpush3.bf16.msra.mxu1 %v449_v23 }
  0x46   :  { %424 = vmatpush3.bf16.msra.mxu0 %v421_v20  ;;  %454 = vmatprep.subr.bf16.mxu1 %v453_v29  ;;  %p553_p0 = pnand %p552_p13, %p546_p10 }
  0x47   :  { %426 = vmatprep.subr.bf16.mxu0 %v425_v26 }
  0x49   :  { %456 = vmatpush3.bf16.msra.mxu1 %v453_v29 }
  0x4a   :  { %428 = vmatpush3.bf16.msra.mxu0 %v425_v26  ;;  %458 = vmatprep.subr.bf16.mxu1 %v457_v35 }
  0x4b   :  { %430 = vmatprep.subr.bf16.mxu0 %v429_v32 }
  0x4d   :  { %460 = vmatpush3.bf16.msra.mxu1 %v457_v35 }
  0x4e   :  { %432 = vmatpush3.bf16.msra.mxu0 %v429_v32  ;;  %462 = vmatprep.subr.bf16.mxu1 %v461_v41 }
  0x4f   :  { %434 = vmatprep.subr.bf16.mxu0 %v433_v38 }
  0x51   :  { %464 = vmatpush3.bf16.msra.mxu1 %v461_v41 }
  0x52   :  { %436 = vmatpush3.bf16.msra.mxu0 %v433_v38  ;;  %466 = vmatprep.subr.bf16.mxu1 %v465_v45 }
  0x53   :  { %438 = vmatprep.subr.bf16.mxu0 %v437_v44 }
  0x55   :  { %468 = vmatpush3.bf16.msra.mxu1 %v465_v45 }
  0x56   :  { %440 = vmatpush3.bf16.msra.mxu0 %v437_v44  ;;  %470 = vmatprep.subr.bf16.mxu1 %v469_v49 }
  0x59   :  { %372 = vmatmul.mubr.f32.vlgmr.msra.gmra.mrb[0].mxu0 %v71_v46  ;;  %472 = vmatpush3.bf16.msra.mxu1 %v469_v49 }
 0x12c   :  { %v373_v51 = vpop.f32.mrb[0].mxu0 }
 0x12d   :  { %v180_v52 = vadd.f32 %v373_v51, %v301_v50  ;;  %v154_v53 = vpop.f32.mrb[1].mxu0 }
 0x12e   :  { %v179_v54 = vadd.f32 %v301_v50, %v154_v53 }
 0x12f   :  { %v182_v56 = vmax.f32 %v180_v52, 0.0 }
 0x130   :  { %v181_v55 = vmax.f32 %v179_v54, 0.0 }
 0x132   :  { %406 = vmatprep.mubr.f32.mxu1 %v181_v55 }
 0x133   :  { %407 = vmatmul.mubr.f32.vlgmr.msra.gmra.mrb[0].mxu1 %v182_v56 }
 0x206   :  { %v408_v58 = vpop.f32.mrb[0].mxu1 }
 0x207   :  { %v278_v59 = vadd.f32 %v408_v58, %v302_v57  ;;  %v272_v60 = vpop.f32.mrb[1].mxu1 }
 0x208   :  { %v273_v61 = vadd.f32 %v302_v57, %v272_v60 }
 0x209   :  { %282 = vst [vmem:[#allocation9 + $0x8] sm:$0xff] %v278_v59 }
 0x20a   :  { %281 = vst [vmem:[#allocation9] sm:$0xff] %v273_v61 }
 0x20b   :  { %556 = shalt.err (!%p553_p0)
}
 0x20c   :  { %s557_s4 = scalar_lea.hbm %s687_s5, 256 }
 0x20d   :  { %p558_p1 = scmp.ne.s32.totalorder %s687_s5, %s557_s4  ;;  %p561_p2 = scmp.lt.u32.totalorder %s557_s4, %s687_s5 }
 0x20f   :  { %p563_p3 = pnand %p561_p2, %p558_p1 }
 0x211   :  { %566 = shalt.err (!%p563_p3)
}
 0x212   :  { %294 = dma.vmem_to_hbm [thread:$0]  %s289_s10, 256, %s687_s5, [#allocation5], %s575_s30, %s575_s30, %s576_s6  }
 0x213   :  { %571 = dma.done.wait [#allocation5], 256  }
 0x214   :  { %572 = vsyncadd [#allocation5], 4294967040 }
 0x215   :  { %298 = vsyncpa [#allocation4], 1 }
 0x216   :  { %299 = vsyncpa [#allocation7], 1 }
 0x217   :  { %300 = vsyncpa [#allocation5], 1 }

</bundles_post_ra>
